<compile_context>
chip_gen: v6e
topology: v6e:2x2x1
jax: 0.10.0
libtpu: 0.0.40
codegen_flags: <defaults>
</compile_context>

<pallas_src>
import jax
import jax.numpy as jnp
from jax.experimental import pallas as pl
from jax.experimental.pallas import tpu as pltpu


def _copy_kernel(x_ref, o_ref):
    # Pure identity copy of one (C, clip_size*F) lane-dense slab.  All
    # addressing is done by the BlockSpec index_map; no in-kernel slicing.
    o_ref[...] = x_ref[...]


def _pick_rows_per_step(num_rows, row_bytes, target_bytes=8 << 20):
    """Rows per grid step: ~target_bytes blocks, multiple of 8 sublanes.

    If the whole array fits in one target-sized block, use it directly
    (block dims equal to full array dims are always layout-legal).
    """
    row_bytes = max(int(row_bytes), 1)
    if num_rows * row_bytes <= target_bytes:
        return num_rows
    c = max(target_bytes // row_bytes, 1)
    c = max((c // 8) * 8, 8)          # multiple of the 8-sublane tile
    return min(c, num_rows)           # == num_rows only if full-dim (legal)


def feats2clip(feats, stride=15, clip_length=15, *, materialize=False):
    """Pallas equivalent of Feats2Clip.forward.

    The op is a metadata-only reshape; the default (materialize=False)
    returns the free jnp.reshape.  With materialize=True a minimal-cost,
    lane-dense Pallas copy produces the same result (fusion placeholder).
    """
    N, F = feats.shape
    clip_size = stride + clip_length
    assert N % clip_size == 0, (
        "view(-1, stride+clip_length, F) requires N % (stride+clip_length) == 0")
    num_clips = N // clip_size

    if not materialize:
        # Free, metadata-only: identical bytes, row-major layout unchanged.
        return feats.reshape(num_clips, clip_size, F)

    # Flatten each clip onto the lane axis: (num_clips, clip_size*F).  This
    # reshape is also free (contiguous row-major), and makes the block layout
    # independent of clip_size / F.
    row = clip_size * F
    flat = feats.reshape(num_clips, row)
    itemsize = feats.dtype.itemsize

    C = _pick_rows_per_step(num_clips, row * itemsize)
    grid = (pl.cdiv(num_clips, C),)
    block = (C, row)

    out_flat = pl.pallas_call(
        _copy_kernel,
        out_shape=jax.ShapeDtypeStruct((num_clips, row), feats.dtype),
        grid_spec=pltpu.PrefetchScalarGridSpec(
            num_scalar_prefetch=0,
            grid=grid,
            in_specs=[pl.BlockSpec(block, lambda i: (i, 0))],
            out_specs=pl.BlockSpec(block, lambda i: (i, 0)),
        ),
        compiler_params=pltpu.CompilerParams(
            dimension_semantics=("parallel",),
            # 4 double-buffered (in+out) ~8 MiB blocks + headroom; safe on
            # v7x (64 MiB physical) and raises v5e's 16 MiB scoped default.
            vmem_limit_bytes=48 * 1024 * 1024,
        ),
        cost_estimate=pl.CostEstimate(
            flops=0,
            transcendentals=0,
            bytes_accessed=2 * num_clips * row * itemsize,
        ),
    )(flat)

    # Free reshape back to the (num_clips, clip_size, F) clip view.
    return out_flat.reshape(num_clips, clip_size, F)


if __name__ == "__main__":
    # Small shapes consistent with the module defaults:
    # clip_size = stride + clip_length = 30, so N = 2 * 30 = 60 frames, F = 128.
    key = jax.random.PRNGKey(0)
    N, F = 60, 128
    feats = jax.random.normal(key, (N, F), dtype=jnp.float32)

    # Exercise the Pallas materialization path once.
    out = feats2clip(feats, stride=15, clip_length=15, materialize=True)
    out = jax.block_until_ready(out)

    # Reference: plain reshape (exact semantics of torch .view).
    ref = feats.reshape(-1, 30, F)
    assert out.shape == (2, 30, F), out.shape
    assert out.dtype == feats.dtype
    assert jnp.array_equal(out, ref), "mismatch vs reshape reference"

    # Default (recommended) path: free metadata-only reshape.
    out_free = feats2clip(feats, stride=15, clip_length=15)
    assert jnp.array_equal(out_free, ref)

    print("KERNEL_OK")
</pallas_src>

<mosaic_0001>
module attributes {stable_mosaic.version = 11 : i64} {
  func.func @_copy_kernel(%arg0: i32, %arg1: memref<2x3840xf32, #tpu.memory_space<vmem>>, %arg2: memref<2x3840xf32, #tpu.memory_space<vmem>>) attributes {dimension_semantics = [#tpu.dimension_semantics<parallel>], iteration_bounds = array<i64: 1>, scalar_prefetch = 0 : i64, scratch_operands = 0 : i64, tpu.core_type = #tpu.core_type<tc>, window_params = [{transform_indices = @transform_0, window_bounds = array<i64: 2, 3840>}, {transform_indices = @transform_1, window_bounds = array<i64: 2, 3840>}]} {
    %c0 = arith.constant 0 : index
    %c0_0 = arith.constant 0 : index
    %0 = vector.load %arg1[%c0, %c0_0] : memref<2x3840xf32, #tpu.memory_space<vmem>>, vector<2x3840xf32>
    %c0_1 = arith.constant 0 : index
    %c0_2 = arith.constant 0 : index
    %1 = vector.load %arg2[%c0_1, %c0_2] : memref<2x3840xf32, #tpu.memory_space<vmem>>, vector<2x3840xf32>
    tpu.vector_store %arg2[%c0_1, %c0_2], %0 {strides = array<i32>} : memref<2x3840xf32, #tpu.memory_space<vmem>>, vector<2x3840xf32>,
    return
  }
  func.func @transform_0(%arg0: i32) -> (i32, i32) {
    %c0_i32 = arith.constant 0 : i32
    %c0_i32_0 = arith.constant 0 : i32
    return %arg0, %c0_i32 : i32, i32
  }
  func.func @transform_1(%arg0: i32) -> (i32, i32) {
    %c0_i32 = arith.constant 0 : i32
    %c0_i32_0 = arith.constant 0 : i32
    return %arg0, %c0_i32 : i32, i32
  }
}

</mosaic_0001>

<bundles_post_ra>
// kernel: tpu_custom_call.1
= control target key start
LH: loop header
LB: loop body
LE: loop exit
PB: predicated region body
PF: predicated region fallthrough
CT: control target
= control target key end

     0   :  { %6 = vsyncpa [#allocation3], 0  ;;  %s116_s0 = inlined_call_operand.hbm [shape: f32[2,3840], index: 0, kind: input, shape index: {}]   ;;  %s117_s1 = inlined_call_operand.hbm [shape: f32[2,3840], index: 1, kind: output, shape index: {}]  }
   0x1   :  { %7 = vsyncpa [#allocation4], 0  ;;  %s98_s6 = smov [#allocation2]  }
   0x2   :  { %s14_s7 = sshll.u32 %s98_s6, 4  ;;  %s15_s7 = int_to_ptr.vmem [resolvable:$true] %s14_s7 }
   0x3   :  { %s62_s8 = scalar_lea.vmem %s15_s7, 960  ;;  %p67_p1 = scmp.lt.s32.totalorder %s15_s7, %s15_s7 }
   0x4   :  { %p63_p0 = scmp.ne.s32.totalorder %s15_s7, %s62_s8  ;;  %p68_p2 = scmp.lt.s32.totalorder %s62_s8, %s62_s8 }
   0x6   :  { %p69_p3 = por %p68_p2, %p67_p1 }
   0x8   :  { %p70_p4 = pnand %p69_p3, %p63_p0 }
   0xa   :  { %73 = shalt.err (!%p70_p4)
}
   0xb   :  { %17 = dma.hbm_to_vmem [thread:$0]  %s116_s0, 960, %s15_s7, [#allocation3]  }
   0xc   :  { %94 = dma.done.wait [#allocation3], 960  }
   0xd   :  { %95 = vsyncadd [#allocation3], 4294966336  ;;  %s99_s11 = smov [#allocation5]   ;;  %v21_v0 = vld [vmem:[#allocation2] sm:$0xff]  ;;  %v22_v1 = vld [vmem:[#allocation2 + $0x8] sm:$0xff] }
   0xe   :  { %s43_s12 = sshll.u32 %s99_s11, 4  ;;  %v23_v2 = vld [vmem:[#allocation2 + $0x10] sm:$0xff]  ;;  %29 = vst [vmem:[#allocation5] sm:$0xff] %v21_v0  ;;  %30 = vst [vmem:[#allocation5 + $0x8] sm:$0xff] %v22_v1  ;;  %v24_v3 = vld [vmem:[#allocation2 + $0x18] sm:$0xff]  ;;  %s44_s12 = int_to_ptr.vmem [resolvable:$true] %s43_s12 }
   0xf   :  { %31 = vst [vmem:[#allocation5 + $0x10] sm:$0xff] %v23_v2  ;;  %v25_v4 = vld [vmem:[#allocation2 + $0x20] sm:$0xff]  ;;  %v26_v5 = vld [vmem:[#allocation2 + $0x28] sm:$0xff]  ;;  %32 = vst [vmem:[#allocation5 + $0x18] sm:$0xff] %v24_v3  ;;  %s74_s0 = scalar_lea.vmem %s44_s12, 960  ;;  %p79_p6 = scmp.lt.s32.totalorder %s44_s12, %s44_s12 }
  0x10   :  { %33 = vst [vmem:[#allocation5 + $0x20] sm:$0xff] %v25_v4  ;;  %34 = vst [vmem:[#allocation5 + $0x28] sm:$0xff] %v26_v5  ;;  %v27_v6 = vld [vmem:[#allocation2 + $0x30] sm:$0xff]  ;;  %v28_v7 = vld [vmem:[#allocation2 + $0x38] sm:$0xf]  ;;  %p75_p5 = scmp.ne.s32.totalorder %s44_s12, %s74_s0  ;;  %p80_p7 = scmp.lt.s32.totalorder %s74_s0, %s74_s0 }
  0x11   :  { %35 = vst [vmem:[#allocation5 + $0x30] sm:$0xff] %v27_v6  ;;  %36 = vst [vmem:[#allocation5 + $0x38] sm:$0xf] %v28_v7 }
  0x12   :  { %p81_p8 = por %p80_p7, %p79_p6 }
  0x14   :  { %p82_p9 = pnand %p81_p8, %p75_p5 }
  0x16   :  { %85 = shalt.err (!%p82_p9)
}
  0x17   :  { %46 = dma.vmem_to_hbm [thread:$0]  %s44_s12, 960, %s117_s1, [#allocation4]  }
  0x18   :  { %96 = dma.done.wait [#allocation4], 960  }
  0x19   :  { %97 = vsyncadd [#allocation4], 4294966336 }
  0x1a   :  { %50 = vsyncpa [#allocation3], 1 }
  0x1b   :  { %51 = vsyncpa [#allocation4], 1 }

</bundles_post_ra>
